<compile_context>
chip_gen: v7x
topology: tpu7x:2x2x1
jax: 0.10.0
libtpu: 0.0.40
codegen_flags: <defaults>
</compile_context>

<pallas_src>
import functools

import jax
import jax.numpy as jnp
from jax.experimental import pallas as pl
from jax.experimental.pallas import tpu as pltpu

_LANES = 128


def _conv1x1_kernel(w_ref, b_ref, x_ref, o_ref, *, cin, cout, compute_dtype):
    # w_ref: SMEM (cout, cin); b_ref: SMEM (cout,)
    # x_ref: VMEM (nb, cin, tseg, 128); o_ref: VMEM (nb, cout, tseg, 128)
    # Load each input channel plane once as a dense (nb, tseg, 128) tile.
    planes = [x_ref[:, ci, :, :].astype(compute_dtype) for ci in range(cin)]
    for co in range(cout):
        acc = planes[0] * w_ref[co, 0].astype(compute_dtype)
        for ci in range(1, cin):
            acc = acc + planes[ci] * w_ref[co, ci].astype(compute_dtype)
        acc = acc + b_ref[co].astype(compute_dtype)
        # Dense (tseg, 128) plane store per output channel (unmasked vst).
        o_ref[:, co, :, :] = acc.astype(o_ref.dtype)


def conv1x1_pallas(x_nchw, weight, bias=None, *,
                   target_block_bytes=8 << 20,
                   min_pallas_bytes=1 << 20,
                   force_pallas=False):
    """x_nchw: (N, Cin, H, W); weight: (Cout, Cin, 1, 1); bias: (Cout,) or None."""
    N, Cin, H, W = x_nchw.shape
    Cout = weight.shape[0]
    HW = H * W

    w2 = weight.reshape(Cout, Cin).astype(jnp.float32)
    if bias is None:
        b1 = jnp.zeros((Cout,), jnp.float32)
    else:
        b1 = bias.reshape(Cout).astype(jnp.float32)

    out_dtype = x_nchw.dtype
    itemsize = jnp.dtype(out_dtype).itemsize
    total_bytes = (N * Cin * HW + N * Cout * HW) * itemsize

    # Tiny problems: pallas_call fixed cost dominates; let XLA fuse instead.
    if total_bytes < min_pallas_bytes and not force_pallas:
        y = jnp.einsum("oc,nchw->nohw", w2, x_nchw.astype(jnp.float32))
        y = y + b1.reshape(1, Cout, 1, 1)
        return y.astype(out_dtype)

    # bf16 fast path: keep the tile in bf16 (v6e/v7x VPU is bf16-native);
    # everything else accumulates in f32.
    compute_dtype = jnp.bfloat16 if out_dtype == jnp.bfloat16 else jnp.float32

    # ---- Pixel-major dense layout: (N, Cin, R, 128) ----
    x3 = x_nchw.reshape(N, Cin, HW)               # free (contiguous) reshape
    HW_pad = pl.cdiv(HW, _LANES) * _LANES
    if HW_pad != HW:
        x3 = jnp.pad(x3, ((0, 0), (0, 0), (0, HW_pad - HW)))
    R = HW_pad // _LANES
    x4 = x3.reshape(N, Cin, R, _LANES)

    # ---- Block sizing: ~target_block_bytes of in+out traffic per step ----
    bytes_per_row = (Cin + Cout) * _LANES * itemsize
    rows_target = max(8, (target_block_bytes // bytes_per_row) // 8 * 8)

    if R <= rows_target:
        tseg = R                                   # full spatial extent per image
        nb = max(1, min(N, rows_target // R))      # pack several images per step
        if N > 1:                                  # keep >= 2 grid steps (v7x: 2 TCs)
            nb = min(nb, pl.cdiv(N, 2))
    else:
        nb = 1
        tseg = rows_target                         # multiple of 8; ragged tail masked

    grid = (pl.cdiv(N, nb), pl.cdiv(R, tseg))

    in_block_bytes = nb * Cin * tseg * _LANES * itemsize
    out_block_bytes = nb * Cout * tseg * _LANES * itemsize
    # 2x for double buffering plus slack; explicit so v5e's 16 MiB default
    # scoped limit does not reject / shallow-pipeline MB-scale tiles; capped
    # to stay under v7x's 64 MiB physical VMEM.
    vmem_limit = int(2 * (in_block_bytes + out_block_bytes) + (4 << 20))
    vmem_limit = min(vmem_limit, 56 << 20)

    kernel = functools.partial(_conv1x1_kernel, cin=Cin, cout=Cout,
                               compute_dtype=compute_dtype)

    out4 = pl.pallas_call(
        kernel,
        out_shape=jax.ShapeDtypeStruct((N, Cout, R, _LANES), out_dtype),
        grid_spec=pltpu.PrefetchScalarGridSpec(
            num_scalar_prefetch=0,
            grid=grid,
            in_specs=[
                pl.BlockSpec(memory_space=pltpu.MemorySpace.SMEM),     # weight
                pl.BlockSpec(memory_space=pltpu.MemorySpace.SMEM),     # bias
                pl.BlockSpec((nb, Cin, tseg, _LANES),
                             lambda n, m: (n, 0, m, 0)),               # x tile
            ],
            out_specs=pl.BlockSpec((nb, Cout, tseg, _LANES),
                                   lambda n, m: (n, 0, m, 0)),
        ),
        compiler_params=pltpu.CompilerParams(
            dimension_semantics=("parallel", "parallel"),
            vmem_limit_bytes=vmem_limit,
        ),
    )(w2, b1, x4)

    out3 = out4.reshape(N, Cout, HW_pad)
    if HW_pad != HW:
        out3 = out3[:, :, :HW]
    return out3.reshape(N, Cout, H, W)


if __name__ == "__main__":
    # Module defaults: dim1=3, dim2=3, bias=True.
    dim1, dim2 = 3, 3

    key = jax.random.PRNGKey(0)
    kx, kw, kb, kx2 = jax.random.split(key, 4)

    # Deterministic synthetic parameters (shapes match nn.Conv2d(dim1, dim2, 1)).
    fan_in = dim1  # kernel_size=1 -> fan_in = dim1
    bound = 1.0 / (fan_in ** 0.5)
    weight = jax.random.uniform(kw, (dim2, dim1, 1, 1), jnp.float32, -bound, bound)
    bias = jax.random.uniform(kb, (dim2,), jnp.float32, -bound, bound)

    def ref(x):
        return (jnp.einsum("oc,nchw->nohw", weight.reshape(dim2, dim1), x)
                + bias.reshape(1, dim2, 1, 1))

    # Case 1: small NCHW with HW a multiple of 128 (force the Pallas path).
    x1 = jax.random.normal(kx, (2, dim1, 16, 16), jnp.float32)
    y1 = jax.block_until_ready(conv1x1_pallas(x1, weight, bias, force_pallas=True))
    assert y1.shape == (2, dim2, 16, 16)
    assert jnp.allclose(y1, ref(x1), atol=1e-5, rtol=1e-5)

    # Case 2: HW not a multiple of 128 (exercises the lane-padding path).
    x2 = jax.random.normal(kx2, (2, dim1, 10, 10), jnp.float32)
    y2 = jax.block_until_ready(conv1x1_pallas(x2, weight, bias, force_pallas=True))
    assert y2.shape == (2, dim2, 10, 10)
    assert jnp.allclose(y2, ref(x2), atol=1e-5, rtol=1e-5)

    # Case 3: tiny-problem auto-fallback (einsum path) stays correct.
    y3 = jax.block_until_ready(conv1x1_pallas(x1, weight, bias))
    assert jnp.allclose(y3, ref(x1), atol=1e-5, rtol=1e-5)

    print("KERNEL_OK")
</pallas_src>

<mosaic_0001>
module attributes {stable_mosaic.version = 11 : i64} {
  func.func @_conv1x1_kernel(%arg0: i32, %arg1: i32, %arg2: memref<3x3xf32, #tpu.memory_space<smem>>, %arg3: memref<3xf32, #tpu.memory_space<smem>>, %arg4: memref<1x3x2x128xf32, #tpu.memory_space<vmem>>, %arg5: memref<1x3x2x128xf32, #tpu.memory_space<vmem>>) attributes {dimension_semantics = [#tpu.dimension_semantics<parallel>, #tpu.dimension_semantics<parallel>], iteration_bounds = array<i64: 2, 1>, scalar_prefetch = 0 : i64, scratch_operands = 0 : i64, tpu.core_type = #tpu.core_type<tc>, window_params = [{transform_indices = @transform_0, window_bounds = array<i64: 3, 3>}, {transform_indices = @transform_1, window_bounds = array<i64: 3>}, {transform_indices = @transform_2, window_bounds = array<i64: 1, 3, 2, 128>}, {transform_indices = @transform_3, window_bounds = array<i64: 1, 3, 2, 128>}]} {
    %c0 = arith.constant 0 : index
    %c0_0 = arith.constant 0 : index
    %c0_1 = arith.constant 0 : index
    %c0_2 = arith.constant 0 : index
    %0 = vector.load %arg4[%c0, %c0_0, %c0_1, %c0_2] : memref<1x3x2x128xf32, #tpu.memory_space<vmem>>, vector<1x1x2x128xf32>
    %1 = vector.shape_cast %0 : vector<1x1x2x128xf32> to vector<1x2x128xf32>
    %c0_3 = arith.constant 0 : index
    %c1 = arith.constant 1 : index
    %c0_4 = arith.constant 0 : index
    %c0_5 = arith.constant 0 : index
    %2 = vector.load %arg4[%c0_3, %c1, %c0_4, %c0_5] : memref<1x3x2x128xf32, #tpu.memory_space<vmem>>, vector<1x1x2x128xf32>
    %3 = vector.shape_cast %2 : vector<1x1x2x128xf32> to vector<1x2x128xf32>
    %c0_6 = arith.constant 0 : index
    %c2 = arith.constant 2 : index
    %c0_7 = arith.constant 0 : index
    %c0_8 = arith.constant 0 : index
    %4 = vector.load %arg4[%c0_6, %c2, %c0_7, %c0_8] : memref<1x3x2x128xf32, #tpu.memory_space<vmem>>, vector<1x1x2x128xf32>
    %5 = vector.shape_cast %4 : vector<1x1x2x128xf32> to vector<1x2x128xf32>
    %c0_9 = arith.constant 0 : index
    %c0_10 = arith.constant 0 : index
    %6 = memref.load %arg2[%c0_9, %c0_10] : memref<3x3xf32, #tpu.memory_space<smem>>
    %7 = vector.broadcast %6 : f32 to vector<1x2x128xf32>
    %8 = arith.mulf %1, %7 : vector<1x2x128xf32>
    %c0_11 = arith.constant 0 : index
    %c1_12 = arith.constant 1 : index
    %9 = memref.load %arg2[%c0_11, %c1_12] : memref<3x3xf32, #tpu.memory_space<smem>>
    %10 = vector.broadcast %9 : f32 to vector<1x2x128xf32>
    %11 = arith.mulf %3, %10 : vector<1x2x128xf32>
    %12 = arith.addf %8, %11 : vector<1x2x128xf32>
    %c0_13 = arith.constant 0 : index
    %c2_14 = arith.constant 2 : index
    %13 = memref.load %arg2[%c0_13, %c2_14] : memref<3x3xf32, #tpu.memory_space<smem>>
    %14 = vector.broadcast %13 : f32 to vector<1x2x128xf32>
    %15 = arith.mulf %5, %14 : vector<1x2x128xf32>
    %16 = arith.addf %12, %15 : vector<1x2x128xf32>
    %c0_15 = arith.constant 0 : index
    %17 = memref.load %arg3[%c0_15] : memref<3xf32, #tpu.memory_space<smem>>
    %18 = vector.broadcast %17 : f32 to vector<1x2x128xf32>
    %19 = arith.addf %16, %18 : vector<1x2x128xf32>
    %c0_16 = arith.constant 0 : index
    %c0_17 = arith.constant 0 : index
    %c0_18 = arith.constant 0 : index
    %c0_19 = arith.constant 0 : index
    %20 = vector.load %arg5[%c0_16, %c0_17, %c0_18, %c0_19] : memref<1x3x2x128xf32, #tpu.memory_space<vmem>>, vector<1x1x2x128xf32>
    %21 = vector.shape_cast %20 : vector<1x1x2x128xf32> to vector<1x2x128xf32>
    %22 = vector.shape_cast %19 : vector<1x2x128xf32> to vector<1x1x2x128xf32>
    tpu.vector_store %arg5[%c0_16, %c0_17, %c0_18, %c0_19], %22 {strides = array<i32>} : memref<1x3x2x128xf32, #tpu.memory_space<vmem>>, vector<1x1x2x128xf32>,
    %c1_20 = arith.constant 1 : index
    %c0_21 = arith.constant 0 : index
    %23 = memref.load %arg2[%c1_20, %c0_21] : memref<3x3xf32, #tpu.memory_space<smem>>
    %24 = vector.broadcast %23 : f32 to vector<1x2x128xf32>
    %25 = arith.mulf %1, %24 : vector<1x2x128xf32>
    %c1_22 = arith.constant 1 : index
    %c1_23 = arith.constant 1 : index
    %26 = memref.load %arg2[%c1_22, %c1_23] : memref<3x3xf32, #tpu.memory_space<smem>>
    %27 = vector.broadcast %26 : f32 to vector<1x2x128xf32>
    %28 = arith.mulf %3, %27 : vector<1x2x128xf32>
    %29 = arith.addf %25, %28 : vector<1x2x128xf32>
    %c1_24 = arith.constant 1 : index
    %c2_25 = arith.constant 2 : index
    %30 = memref.load %arg2[%c1_24, %c2_25] : memref<3x3xf32, #tpu.memory_space<smem>>
    %31 = vector.broadcast %30 : f32 to vector<1x2x128xf32>
    %32 = arith.mulf %5, %31 : vector<1x2x128xf32>
    %33 = arith.addf %29, %32 : vector<1x2x128xf32>
    %c1_26 = arith.constant 1 : index
    %34 = memref.load %arg3[%c1_26] : memref<3xf32, #tpu.memory_space<smem>>
    %35 = vector.broadcast %34 : f32 to vector<1x2x128xf32>
    %36 = arith.addf %33, %35 : vector<1x2x128xf32>
    %c0_27 = arith.constant 0 : index
    %c1_28 = arith.constant 1 : index
    %c0_29 = arith.constant 0 : index
    %c0_30 = arith.constant 0 : index
    %37 = vector.load %arg5[%c0_27, %c1_28, %c0_29, %c0_30] : memref<1x3x2x128xf32, #tpu.memory_space<vmem>>, vector<1x1x2x128xf32>
    %38 = vector.shape_cast %37 : vector<1x1x2x128xf32> to vector<1x2x128xf32>
    %39 = vector.shape_cast %36 : vector<1x2x128xf32> to vector<1x1x2x128xf32>
    tpu.vector_store %arg5[%c0_27, %c1_28, %c0_29, %c0_30], %39 {strides = array<i32>} : memref<1x3x2x128xf32, #tpu.memory_space<vmem>>, vector<1x1x2x128xf32>,
    %c2_31 = arith.constant 2 : index
    %c0_32 = arith.constant 0 : index
    %40 = memref.load %arg2[%c2_31, %c0_32] : memref<3x3xf32, #tpu.memory_space<smem>>
    %41 = vector.broadcast %40 : f32 to vector<1x2x128xf32>
    %42 = arith.mulf %1, %41 : vector<1x2x128xf32>
    %c2_33 = arith.constant 2 : index
    %c1_34 = arith.constant 1 : index
    %43 = memref.load %arg2[%c2_33, %c1_34] : memref<3x3xf32, #tpu.memory_space<smem>>
    %44 = vector.broadcast %43 : f32 to vector<1x2x128xf32>
    %45 = arith.mulf %3, %44 : vector<1x2x128xf32>
    %46 = arith.addf %42, %45 : vector<1x2x128xf32>
    %c2_35 = arith.constant 2 : index
    %c2_36 = arith.constant 2 : index
    %47 = memref.load %arg2[%c2_35, %c2_36] : memref<3x3xf32, #tpu.memory_space<smem>>
    %48 = vector.broadcast %47 : f32 to vector<1x2x128xf32>
    %49 = arith.mulf %5, %48 : vector<1x2x128xf32>
    %50 = arith.addf %46, %49 : vector<1x2x128xf32>
    %c2_37 = arith.constant 2 : index
    %51 = memref.load %arg3[%c2_37] : memref<3xf32, #tpu.memory_space<smem>>
    %52 = vector.broadcast %51 : f32 to vector<1x2x128xf32>
    %53 = arith.addf %50, %52 : vector<1x2x128xf32>
    %c0_38 = arith.constant 0 : index
    %c2_39 = arith.constant 2 : index
    %c0_40 = arith.constant 0 : index
    %c0_41 = arith.constant 0 : index
    %54 = vector.load %arg5[%c0_38, %c2_39, %c0_40, %c0_41] : memref<1x3x2x128xf32, #tpu.memory_space<vmem>>, vector<1x1x2x128xf32>
    %55 = vector.shape_cast %54 : vector<1x1x2x128xf32> to vector<1x2x128xf32>
    %56 = vector.shape_cast %53 : vector<1x2x128xf32> to vector<1x1x2x128xf32>
    tpu.vector_store %arg5[%c0_38, %c2_39, %c0_40, %c0_41], %56 {strides = array<i32>} : memref<1x3x2x128xf32, #tpu.memory_space<vmem>>, vector<1x1x2x128xf32>,
    return
  }
  func.func @transform_0(%arg0: i32, %arg1: i32) -> (i32, i32) {
    %c0_i32 = arith.constant 0 : i32
    %c0_i32_0 = arith.constant 0 : i32
    %c0_i32_1 = arith.constant 0 : i32
    return %c0_i32, %c0_i32_0 : i32, i32
  }
  func.func @transform_1(%arg0: i32, %arg1: i32) -> i32 {
    %c0_i32 = arith.constant 0 : i32
    %c0_i32_0 = arith.constant 0 : i32
    return %c0_i32 : i32
  }
  func.func @transform_2(%arg0: i32, %arg1: i32) -> (i32, i32, i32, i32) {
    %c0_i32 = arith.constant 0 : i32
    %c0_i32_0 = arith.constant 0 : i32
    %c0_i32_1 = arith.constant 0 : i32
    return %arg0, %c0_i32, %arg1, %c0_i32_0 : i32, i32, i32, i32
  }
  func.func @transform_3(%arg0: i32, %arg1: i32) -> (i32, i32, i32, i32) {
    %c0_i32 = arith.constant 0 : i32
    %c0_i32_0 = arith.constant 0 : i32
    %c0_i32_1 = arith.constant 0 : i32
    return %arg0, %c0_i32, %arg1, %c0_i32_0 : i32, i32, i32, i32
  }
}

</mosaic_0001>

<bundles_post_ra>
// kernel: tpu_custom_call.1
= control target key start
LH: loop header
LB: loop body
LE: loop exit
PB: predicated region body
PF: predicated region fallthrough
CT: control target
= control target key end

     0   :  { %8 = vsyncpa [#allocation5], 0  ;;  %s938_s0 = inlined_call_operand.hbm [shape: f32[3,3], index: 0, kind: input, shape index: {}]   ;;  %s939_s1 = inlined_call_operand.vmem [shape: f32[3], index: 1, kind: input, shape index: {}]   ;;  %s940_s2 = inlined_call_operand.hbm [shape: f32[2,3,2,128], index: 2, kind: input, shape index: {}]   ;;  %s941_s3 = inlined_call_operand.hbm [shape: f32[2,3,2,128], index: 3, kind: output, shape index: {}]  }
   0x1   :  { %9 = vsyncpa [#allocation6], 0 }
   0x2   :  { %10 = vsyncpa [#allocation3], 0 }
   0x3   :  { %12 = vsyncpa [#allocation3 + $0x1], 0 }
   0x4   :  { %13 = vsyncpa [#allocation4], 0 }
   0x5   :  { %15 = vsyncpa [#allocation4 + $0x1], 0  ;;  %s703_s12 = smov 0   ;;  %s705_s13 = smov 0  }
   0x6   :  { %s707_s14 = smov 0   ;;  %s709_s15 = smov 0  }
   0x7   :  { %s711_s16 = smov 0   ;;  %s713_s17 = smov 0  }
   0x8 LB: > { %s407_s18 = sadd.s32 4294967295, %s673_s17   ;;  %s408_s19 = sadd.s32 4294967294, %s673_s17   ;;  %s673_s17 = sphi %s713_s17, %s21_s17   ;;  %s669_s16 = sphi %s711_s16, %s962_s16   ;;  %s665_s15 = sphi %s709_s15, %s961_s15   ;;  %s661_s14 = sphi %s707_s14, %s960_s14   ;;  %s657_s13 = sphi %s705_s13, %s959_s13   ;;  %s653_s12 = sphi %s703_s12, %s958_s12  }
   0x9   : > { %s84_s20 = sadd.s32 1, %s661_s14  ;;  %p91_p0 = scmp.ne.s32.totalorder %s661_s14, %s657_s13 }
   0xa   : > { %p92_p1 = scmp.eq.s32.totalorder %s673_s17, 0  ;;  %p97_p2 = scmp.ne.s32.totalorder %s657_s13, %s653_s12 }
   0xb   : > { %p741_p3 = scmp.eq.s32.totalorder %s407_s18, 0  ;;  %p123_p4 = scmp.eq.s32.totalorder %s407_s18, 1 }
   0xc   : > { %p93_p5 = por %p92_p1, %p91_p0  ;;  %p129_p6 = scmp.eq.s32.totalorder %s408_s19, 1 }
   0xd   : > { %s946_s21 = scalar_select %p741_p3, 1, 0 }
   0xe   : > { %p747_p7 = por %p741_p3, %p97_p2  ;;  %p751_p8 = por %p123_p4, %p91_p0 }
   0xf   : > { %p755_p9 = por %p129_p6, %p97_p2  ;;  %p409_p10 = scmp.ge.s32.totalorder %s673_s17, 1 }
  0x10   : > { %s947_s22 = scalar_select %p747_p7, 1, 0 }
  0x11   : > { %s948_s23 = scalar_select %p751_p8, 1, 0 }
  0x12   : > { %s949_s24 = scalar_select %p755_p9, 1, 0 }
  0x13   : > { %p136_p11 = scmp.lt.s32.totalorder %s673_s17, 3  ;;  %p467_p1 = scmp.lt.s32.totalorder %s673_s17, 2 }
  0x14   : > { %s158_s28 = sshll.u32 %s939_s1, 4  ;;  %s169_s4 = sand.u32 1, %s661_s14   ;;  %s159_s28 = int_to_ptr.vmem [resolvable:$true] %s158_s28 }
  0x15   : > { %p762_p13 = pnand %p409_p10, %p136_p11  ;;  %p772_p4 = pnand %p467_p1, %p93_p5 }
  0x16   : > { %s33_s5 = sadd.s32 1, %s669_s16  ;;  %s525_s8 = scalar_lea.hbm %s938_s0, 64 }
  0x17   : > { %p450_p0 = pneg %p762_p13  ;;  %p526_p5 = scmp.ne.s32.totalorder %s938_s0, %s525_s8 }
  0x18   : > { %p532_p1 = scmp.lt.u32.totalorder %s525_s8, %s938_s0 }
  0x19   : > { %p778_p2 = pnand %p450_p0, %p741_p3 }
  0x1b   : > { %p527_p6 = pneg %p778_p2 }
  0x1d   : > { %p528_p10 = pnand %p527_p6, %p526_p5 }
  0x1f   : > { %p529_p11 = pneg %p528_p10 }
  0x21   : > { %p534_p0 = pnand %p532_p1, %p529_p11 }
  0x23   : > { %537 = shalt.err (!%p534_p0)
}
  0x24   : > { %s675_s19 = smov [#allocation2]   ;;  %s538_s6 = scalar_lea.vmem %s159_s28, 16 }
  0x25   : > { %453 = dma.hbm_to_smem (!%p778_p2), %s938_s0, 64, %s675_s19, [#allocation5]  }
  0x26   : > { %p539_p12 = scmp.ne.s32.totalorder %s159_s28, %s538_s6  ;;  %p546_p7 = scmp.lt.s32.totalorder %s159_s28, %s159_s28 }
  0x27   : > { %p547_p5 = scmp.lt.s32.totalorder %s538_s6, %s538_s6 }
  0x28   : > { %p541_p9 = pnand %p539_p12, %p527_p6 }
  0x29   : > { %p548_p10 = por %p547_p5, %p546_p7 }
  0x2a   : > { %p542_p8 = pneg %p541_p9 }
  0x2c   : > { %p549_p3 = pnand %p548_p10, %p542_p8 }
  0x2e   : > { %552 = shalt.err (!%p549_p3)
}
  0x2f   : > { %s676_s7 = smov [#allocation7]   ;;  %p35_p11 = scmp.ge.s32.totalorder %s33_s5, 2 }
  0x30   : > { %456 = dma.vmem_to_smem (!%p778_p2), %s159_s28, 16, %s676_s7, [#allocation6]  }
  0x31   : > { %s434_s8 = smul.u32 6, %s169_s4  ;;  %s964_s5 = smov (%p35_p11, %s33_s5), 0 }
  0x32   : > { %s435_s9 = smul.u32 96, %s669_s16  ;;  %s79_s10 = ssub.s32 %s669_s16, %s964_s5 }
  0x33   : > { %s173_s11 = scalar_lea.vmem [#allocation8], %s434_s8  ;;  %p82_p3 = scmp.eq.s32.totalorder %s79_s10, 0 }
  0x34   : > { %s181_s18 = sshll.u32 %s173_s11, 4  ;;  %s812_s26 = scalar_lea.hbm %s940_s2, %s435_s9  ;;  %s814_s18 = int_to_ptr.vmem [resolvable:$true] %s181_s18 }
  0x35   : > { %s819_s28 = scalar_select %p82_p3, %s661_s14, %s84_s20  }
  0x36   : > { %s823_s27 = scalar_lea.sflag [#allocation3], %s169_s4  ;;  %s553_s6 = scalar_lea.hbm %s812_s26, 96 }
  0x37   : > { %p554_p7 = scmp.ne.s32.totalorder %s812_s26, %s553_s6  ;;  %p555_p8 = pneg %p772_p4 }
  0x38   : > { %s558_s9 = scalar_lea.hbm %s940_s2, 192  ;;  %p559_p2 = scmp.lt.u32.totalorder %s812_s26, %s940_s2 }
  0x39   : > { %p556_p9 = pnand %p555_p8, %p554_p7  ;;  %p560_p6 = scmp.lt.u32.totalorder %s558_s9, %s553_s6 }
  0x3a   : > { %p562_p0 = scmp.lt.u32.totalorder %s553_s6, %s812_s26 }
  0x3b   : > { %p557_p12 = pneg %p556_p9  ;;  %p561_p1 = por %p560_p6, %p559_p2 }
  0x3d   : > { %p563_p5 = por %p562_p0, %p561_p1 }
  0x3f   : > { %p564_p10 = pnand %p563_p5, %p557_p12 }
  0x41   : > { %567 = shalt.err (!%p564_p10)
}
  0x42   : > { %s568_s20 = scalar_lea.vmem %s814_s18, 96  ;;  %s677_s4 = smov [#allocation8]  }
  0x43   : > { %p569_p11 = scmp.ne.s32.totalorder %s814_s18, %s568_s20  ;;  %s573_s30 = sshll.u32 %s677_s4, 4  ;;  %s574_s30 = int_to_ptr.vmem [resolvable:$false] %s573_s30 }
  0x44   : > { %s575_s19 = scalar_lea.vmem %s574_s30, 192  ;;  %p576_p9 = scmp.lt.s32.totalorder %s814_s18, %s574_s30 }
  0x45   : > { %p571_p3 = pnand %p569_p11, %p555_p8  ;;  %p577_p2 = scmp.lt.s32.totalorder %s575_s19, %s568_s20 }
  0x47   : > { %p572_p7 = pneg %p571_p3  ;;  %p578_p6 = por %p577_p2, %p576_p9 }
  0x49   : > { %p579_p1 = pnand %p578_p6, %p572_p7 }
  0x4b   : > { %582 = shalt.err (!%p579_p1)
}
  0x4c   : > { %s678_s6 = smov 32   ;;  %s679_s7 = smov 2  }
  0x4d   : > { %460 = dma.hbm_to_vmem [thread:$0]  (!%p772_p4), %s812_s26, 96, %s814_s18, %s823_s27, %s678_s6, %s678_s6, %s679_s7  }
  0x4e   : > { %193 = sbr.rel (%p762_p13) target bundleno = 129 (0x81), region = 32  ;;  %p953_p8 = scmp.ne.s32.totalorder (!%p762_p13), %s946_s21, 0 }
  0x55   : > { %636 = dma.done.wait (%p953_p8), [#allocation5], 64  }
  0x56   : > { %638 = vsyncadd (%p953_p8), [#allocation5], 4294967232 }
  0x57   : > { %640 = dma.done.wait (%p953_p8), [#allocation6], 16  }
  0x58   : > { %642 = vsyncadd (%p953_p8), [#allocation6], 4294967280  ;;  %s862_s8 = sand.u32 1, %s657_s13   ;;  %p954_p13 = scmp.ne.s32.totalorder %s947_s22, 0 }
  0x59   : > { %s436_s25 = smul.u32 6, %s862_s8  ;;  %s204_s29 = scalar_lea.sflag [#allocation3], %s862_s8 }
  0x5b   : > { %s207_s18 = scalar_lea.vmem [#allocation8], %s436_s25 }
  0x5c   : > { %644 = dma.done.wait (%p954_p13), %s204_s29, 96  }
  0x5d   : > { %646 = vsyncadd (%p954_p13), %s204_s29, 4294967200 }
  0x5e   : > { %212 = sfence }
  0x5f   : > { %s236_s26 = sld [smem:[#allocation2]]  ;;  %s419_s21 = sld [smem:[#allocation2 + $0x1]]  ;;  %v231_v0 = vld [vmem:[%s207_s18] sm:$0x3]  ;;  %v417_v1 = vld [vmem:[%s207_s18 + $0x2] sm:$0x3] }
  0x60   : > { %s420_s27 = sld [smem:[#allocation2 + $0x2]]  ;;  %s872_s9 = sld [smem:[#allocation7]]  ;;  %v418_v2 = vld [vmem:[%s207_s18 + $0x4] sm:$0x3] }
  0x61   : > { %s421_s10 = sld [smem:[#allocation2 + $0x80]]  ;;  %s422_s11 = sld [smem:[#allocation2 + $0x81]] }
  0x62   : > { %s423_s20 = sld [smem:[#allocation2 + $0x82]]  ;;  %s874_s4 = sld [smem:[#allocation7 + $0x1]] }
  0x63   : > { %s426_s30 = sld [smem:[#allocation2 + $0x100]]  ;;  %s427_s19 = sld [smem:[#allocation2 + $0x101]] }
  0x64   : > { %s428_s22 = sld [smem:[#allocation2 + $0x102]]  ;;  %s230_s7 = scalar_lea.vmem [#allocation9], %s436_s25 }
  0x65   : > { %v237_v3 = vstv %s236_s26  ;;  %v240_v4 = vstv %s419_s21  ;;  %s876_s6 = sld [smem:[#allocation7 + $0x2]]  ;;  %s298_s29 = sshll.u32 %s230_s7, 4  ;;  %s884_s29 = int_to_ptr.vmem [resolvable:$true] %s298_s29 }
  0x66   : > { %v238_v5 = vmul.f32 %v237_v3, %v231_v0  ;;  %v241_v6 = vmul.f32 %v417_v1, %v240_v4  ;;  %v244_v7 = vstv %s420_s27  ;;  %v248_v13 = vstv %s872_s9  ;;  %s437_s18 = smul.u32 96, %s665_s15  ;;  %s284_s27 = scalar_lea.sflag [#allocation4], %s862_s8 }
  0x67   : > { %v245_v8 = vmul.f32 %v418_v2, %v244_v7  ;;  %v252_v9 = vstv %s421_s10  ;;  %v255_v12 = vstv %s422_s11  ;;  %s583_s9 = scalar_lea.vmem %s884_s29, 96  ;;  %p955_p12 = scmp.ne.s32.totalorder %s948_s23, 0 }
  0x68   : > { %v242_v10 = vadd.f32 %v241_v6, %v238_v5  ;;  %v253_v11 = vmul.f32 %v252_v9, %v231_v0  ;;  %v256_v14 = vmul.f32 %v417_v1, %v255_v12  ;;  %v259_v15 = vstv %s423_s20  ;;  %s889_s25 = scalar_lea.hbm %s941_s3, %s437_s18  ;;  %p584_p4 = scmp.ne.s32.totalorder %s884_s29, %s583_s9 }
  0x69   : > { %v260_v17 = vmul.f32 %v418_v2, %v259_v15  ;;  %v268_v18 = vstv %s426_s30  ;;  %v271_v19 = vstv %s427_s19  ;;  %v263_v25 = vstv %s874_s4  ;;  %s680_s15 = smov [#allocation9]  }
  0x6a   : > { %v246_v16 = vadd.f32 %v245_v8, %v242_v10  ;;  %v257_v20 = vadd.f32 %v256_v14, %v253_v11  ;;  %v269_v21 = vmul.f32 %v268_v18, %v231_v0  ;;  %v272_v22 = vmul.f32 %v417_v1, %v271_v19  ;;  %p585_p0 = pnand %p584_p4, %p955_p12  ;;  %s587_s10 = sshll.u32 %s680_s15, 4  ;;  %s588_s10 = int_to_ptr.vmem [resolvable:$false] %s587_s10 }
  0x6b   : > { %v275_v23 = vstv %s428_s22  ;;  %v279_v29 = vstv %s876_s6  ;;  %s589_s11 = scalar_lea.vmem %s588_s10, 192  ;;  %p590_p10 = scmp.lt.s32.totalorder %s884_s29, %s588_s10 }
  0x6c   : > { %v249_v24 = vadd.f32 %v248_v13, %v246_v16  ;;  %v276_v26 = vmul.f32 %v418_v2, %v275_v23  ;;  %v261_v27 = vadd.f32 %v260_v17, %v257_v20  ;;  %v273_v28 = vadd.f32 %v272_v22, %v269_v21  ;;  %p586_p5 = pneg %p585_p0  ;;  %p591_p11 = scmp.lt.s32.totalorder %s589_s11, %s583_s9 }
  0x6e   : > { %250 = vst [vmem:[%s230_s7] sm:$0x3] %v249_v24  ;;  %v264_v30 = vadd.f32 %v263_v25, %v261_v27  ;;  %v277_v31 = vadd.f32 %v276_v26, %v273_v28  ;;  %p592_p3 = por %p591_p11, %p590_p10 }
  0x70   : > { %425 = vst [vmem:[%s230_s7 + $0x2] sm:$0x3] %v264_v30  ;;  %v280_v32 = vadd.f32 %v279_v29, %v277_v31  ;;  %p593_p7 = pnand %p592_p3, %p586_p5 }
  0x72   : > { %430 = vst [vmem:[%s230_s7 + $0x4] sm:$0x3] %v280_v32 }
  0x73   : > { %596 = shalt.err (!%p593_p7)
}
  0x74   : > { %s597_s20 = scalar_lea.hbm %s889_s25, 96  ;;  %s601_s19 = scalar_lea.hbm %s941_s3, 192 }
  0x75   : > { %p598_p9 = scmp.ne.s32.totalorder %s889_s25, %s597_s20  ;;  %p602_p1 = scmp.lt.u32.totalorder %s889_s25, %s941_s3 }
  0x76   : > { %p603_p8 = scmp.lt.u32.totalorder %s601_s19, %s597_s20  ;;  %p605_p4 = scmp.lt.u32.totalorder %s597_s20, %s889_s25 }
  0x77   : > { %p599_p2 = pnand %p598_p9, %p955_p12 }
  0x78   : > { %p604_p13 = por %p603_p8, %p602_p1 }
  0x79   : > { %p600_p6 = pneg %p599_p2 }
  0x7a   : > { %p606_p0 = por %p605_p4, %p604_p13 }
  0x7c   : > { %p607_p5 = pnand %p606_p0, %p600_p6 }
  0x7e   : > { %610 = shalt.err (!%p607_p5)
}
  0x7f   : > { %s681_s7 = smov 32   ;;  %s682_s18 = smov 2  }
  0x80   : > { %448 = dma.vmem_to_hbm [thread:$0]  (%p955_p12), %s884_s29, 96, %s889_s25, %s284_s27, %s681_s7, %s681_s7, %s682_s18  }
  0x81 PF: > { %s313_s26 = sand.u32 1, %s653_s12   ;;  %p956_p10 = scmp.ne.s32.totalorder %s949_s24, 0 }
  0x82   : > { %p957_p11 = scmp.ge.s32.totalorder %s673_s17, 2  ;;  %s314_s21 = scalar_lea.sflag [#allocation4], %s313_s26 }
  0x84   : > { %p462_p3 = pnand %p957_p11, %p956_p10 }
  0x86   : > { %648 = dma.done.wait (!%p462_p3), %s314_s21, 96  }
  0x87   : > { %650 = vsyncadd (!%p462_p3), %s314_s21, 4294967200  ;;  %s21_s17 = sadd.s32 1, %s673_s17   ;;  %s958_s12 = smov %s657_s13 }
  0x88   : > { %p18_p7 = scmp.ge.s32.totalorder %s21_s17, 4   ;;  %s959_s13 = smov %s661_s14 }
  0x89   : > { %s960_s14 = smov %s819_s28  ;;  %s961_s15 = smov %s669_s16 }
  0x8a   : > { %s962_s16 = smov %s964_s5  ;;  %20 = sbr.rel (!%p18_p7) target bundleno = 8 (0x8), region = 91 }
  0x91   :  { %319 = vsyncpa [#allocation3], 1 }
  0x92   :  { %321 = vsyncpa [#allocation3 + $0x1], 1 }
  0x93   :  { %322 = vsyncpa [#allocation4], 1 }
  0x94   :  { %324 = vsyncpa [#allocation4 + $0x1], 1 }
  0x95   :  { %325 = vsyncpa [#allocation5], 1 }
  0x96   :  { %327 = vsyncpa [#allocation5 + $0x1], 1 }
  0x97   :  { %328 = vsyncpa [#allocation6], 1 }
  0x98   :  { %330 = vsyncpa [#allocation6 + $0x1], 1 }

</bundles_post_ra>
